<compile_context>
chip_gen: v6e
topology: v6e:2x2x1
jax: 0.10.0
libtpu: 0.0.40
codegen_flags: <defaults>
</compile_context>

<pallas_src>
import functools

import jax
import jax.numpy as jnp
from jax import lax
from jax.experimental import pallas as pl
from jax.experimental.pallas import tpu as pltpu


def _glstm_recurrence_kernel(gx_ref, whh_ref, out_ref, h_sc, c_sc, *,
                             s_coalesce, unroll):
    # gx_ref : (t_chunk, b_tile, 4*KG) precomputed input gates (+bias),
    #          gate-major columns [i|f|o|g], inner layout g*K + k.
    # whh_ref: (KG, 4*KG) block-diagonal hidden->hidden weights.
    # out_ref: (t_chunk, b_tile, KG) hidden states, columns g*K + k.
    # h_sc/c_sc: (b_tile, KG) f32 VMEM scratch carrying state across chunks.
    t_chunk, _, zg = gx_ref.shape
    kg = zg // 4

    # First T-chunk for this batch tile: zero the carried (h, c) state.
    @pl.when(pl.program_id(1) == 0)
    def _():
        h_sc[...] = jnp.zeros_like(h_sc)
        c_sc[...] = jnp.zeros_like(c_sc)

    whh = whh_ref[...]                          # (KG, 4*KG), loop-invariant

    def superstep(ss, carry):
        h, c = carry                            # (b_tile, KG) f32 each
        t0 = pl.multiple_of(ss * s_coalesce, s_coalesce)
        # One coalesced load of s_coalesce consecutive timesteps of gx.
        gx_blk = gx_ref[pl.ds(t0, s_coalesce)].astype(jnp.float32)
        for s in range(s_coalesce):             # static unroll of cell updates
            gates = gx_blk[s] + jnp.dot(h, whh,
                                        preferred_element_type=jnp.float32)
            sig = jax.nn.sigmoid(gates[:, :3 * kg])      # [ i | f | o ]
            g_g = jnp.tanh(gates[:, 3 * kg:])            #   g
            c = sig[:, kg:2 * kg] * c + sig[:, :kg] * g_g
            h = sig[:, 2 * kg:3 * kg] * jnp.tanh(c)
            out_ref[t0 + s] = h.astype(out_ref.dtype)
        return (h, c)

    n_super = t_chunk // s_coalesce
    h, c = lax.fori_loop(0, n_super, superstep, (h_sc[...], c_sc[...]),
                         unroll=unroll)
    h_sc[...] = h
    c_sc[...] = c


@functools.partial(jax.jit,
                   static_argnames=("K", "t_chunk", "b_tile", "gx_dtype"))
def glstm_forward(x, w_ih, w_hh, b_ih, b_hh, *, K, t_chunk=None, b_tile=None,
                  gx_dtype=jnp.float32):
    """x: (B, T, F). w_ih/w_hh: (K, 4G, G). b_ih/b_hh: (K, 4G)."""
    B, T, F = x.shape
    G = F // K
    KG = K * G
    ZG = 4 * KG
    f32 = jnp.float32

    # ---- static tiling decisions (Python ints) ----------------------------
    if b_tile is None:
        # For v7x dual-TC, pass a b_tile that is a multiple of 8 dividing B.
        b_tile = B
    assert B % b_tile == 0, (B, b_tile)
    s = max(1, 8 // b_tile)                 # timesteps coalesced per gx load
    if t_chunk is None:
        bytes_per_t = b_tile * ZG * 4
        t_chunk = max(s, min(T, (2 * 2 ** 20) // max(bytes_per_t, 1)))
    t_chunk = max(1, min(t_chunk, max(T, 1)))
    while t_chunk % s:                      # keep t_chunk a multiple of s
        s //= 2
    n_chunks = pl.cdiv(T, t_chunk)
    T_pad = n_chunks * t_chunk
    n_super = t_chunk // s
    unroll = max(1, min(4, n_super))        # capped unroll (no full-T unroll)

    # ---- hoisted input projection (one batched MXU einsum for all T) ------
    # Kernel gate order [i|f|o|g] (new j -> PyTorch row block perm[j]); inner
    # column layout within each gate block is g*K + k, which bakes in the
    # module's final permute(0,1,3,2).
    perm = jnp.array((0, 1, 3, 2))
    x4 = x.reshape(B, T, K, G).astype(f32)                      # [b,t,k,gin]
    wih_r = jnp.transpose(w_ih, (0, 2, 1)).reshape(K, G, 4, G).astype(f32)
    whh_r = jnp.transpose(w_hh, (0, 2, 1)).reshape(K, G, 4, G).astype(f32)
    wih_p = jnp.take(wih_r, perm, axis=2)                       # [k,gin,j,gout]
    whh_p = jnp.take(whh_r, perm, axis=2)

    gx = jnp.einsum('btki,kijg->tbjgk', x4, wih_p)              # (T,B,4,G,K)
    bias = jnp.take((b_ih + b_hh).astype(f32).reshape(K, 4, G), perm, axis=1)
    bias = jnp.transpose(bias, (1, 2, 0)).reshape(ZG)           # [j,g,k]
    gx = (gx.reshape(T, B, ZG) + bias).astype(gx_dtype)
    if T_pad != T:
        gx = jnp.pad(gx, ((0, T_pad - T), (0, 0), (0, 0)))

    # Block-diagonal hidden->hidden weight fusing the K groups:
    # rows = gin*K + k, cols = j*KG + gout*K + k2.
    # TODO(synk): for K >> 4 switch to a grouped contraction (this dense form
    #             wastes K-fold MXU FLOPs and weight VMEM).
    eye = jnp.eye(K, dtype=f32)
    whh_bd = jnp.einsum('kijg,kl->ikjgl', whh_p, eye).reshape(KG, ZG)

    block_bytes = 4 * (2 * t_chunk * b_tile * (ZG + KG) + KG * ZG
                       + 2 * b_tile * KG)
    vmem_limit = int(max(16 * 2 ** 20, min(64 * 2 ** 20, 4 * block_bytes)))

    kernel = functools.partial(_glstm_recurrence_kernel,
                               s_coalesce=s, unroll=unroll)
    h = pl.pallas_call(
        kernel,
        out_shape=jax.ShapeDtypeStruct((T_pad, B, KG), f32),
        grid_spec=pltpu.PrefetchScalarGridSpec(
            num_scalar_prefetch=0,
            grid=(B // b_tile, n_chunks),
            in_specs=[
                pl.BlockSpec((t_chunk, b_tile, ZG), lambda bi, ti: (ti, bi, 0)),
                pl.BlockSpec((KG, ZG), lambda bi, ti: (0, 0)),
            ],
            out_specs=pl.BlockSpec((t_chunk, b_tile, KG),
                                   lambda bi, ti: (ti, bi, 0)),
            scratch_shapes=[pltpu.VMEM((b_tile, KG), f32),
                            pltpu.VMEM((b_tile, KG), f32)],
        ),
        compiler_params=pltpu.CompilerParams(
            dimension_semantics=("parallel", "arbitrary"),
            vmem_limit_bytes=vmem_limit),
    )(gx, whh_bd)

    # Hidden columns are already g*K + k (module permute baked in); only the
    # (T, B) -> (B, T) swap remains.
    return h[:T].transpose(1, 0, 2)


def _glstm_reference(x, w_ih, w_hh, b_ih, b_hh, K):
    """Pure-JAX reference of the PyTorch forward (causal branch)."""
    B, T, F = x.shape
    G = F // K
    xg = x.reshape(B, T, K, G)
    outs = []
    for k in range(K):
        wih, whh = w_ih[k], w_hh[k]
        b = b_ih[k] + b_hh[k]

        def cell(carry, x_t):
            h, c = carry
            gates = x_t @ wih.T + h @ whh.T + b
            i = jax.nn.sigmoid(gates[:, 0 * G:1 * G])
            f = jax.nn.sigmoid(gates[:, 1 * G:2 * G])
            g = jnp.tanh(gates[:, 2 * G:3 * G])
            o = jax.nn.sigmoid(gates[:, 3 * G:4 * G])
            c_new = f * c + i * g
            h_new = o * jnp.tanh(c_new)
            return (h_new, c_new), h_new

        h0 = jnp.zeros((B, G), jnp.float32)
        _, hs = lax.scan(cell, (h0, h0),
                         jnp.transpose(xg[:, :, k, :], (1, 0, 2)))
        outs.append(jnp.transpose(hs, (1, 0, 2)))           # (B, T, G)
    h = jnp.stack(outs, axis=2)                              # (B, T, K, G)
    return jnp.transpose(h, (0, 1, 3, 2)).reshape(B, T, G * K)


if __name__ == "__main__":
    # Module config: i_num (feat) = 32, g_num (K) = 2, is_causal = True.
    B, T, I_NUM, K = 2, 16, 32, 2
    G = I_NUM // K

    key = jax.random.PRNGKey(0)
    kx, k1, k2, k3, k4 = jax.random.split(key, 5)
    scale = 1.0 / jnp.sqrt(G)
    x = jax.random.normal(kx, (B, T, I_NUM), jnp.float32)
    w_ih = jax.random.uniform(k1, (K, 4 * G, G), jnp.float32, -scale, scale)
    w_hh = jax.random.uniform(k2, (K, 4 * G, G), jnp.float32, -scale, scale)
    b_ih = jax.random.uniform(k3, (K, 4 * G), jnp.float32, -scale, scale)
    b_hh = jax.random.uniform(k4, (K, 4 * G), jnp.float32, -scale, scale)

    # t_chunk=8 -> two time chunks: exercises the chunked (h, c) carry path.
    out = glstm_forward(x, w_ih, w_hh, b_ih, b_hh, K=K, t_chunk=8)
    out = jax.block_until_ready(out)

    ref = _glstm_reference(x, w_ih, w_hh, b_ih, b_hh, K)
    assert out.shape == (B, T, I_NUM), out.shape
    assert jnp.allclose(out, ref, atol=1e-4, rtol=1e-4), \
        float(jnp.max(jnp.abs(out - ref)))

    print("KERNEL_OK")
</pallas_src>

<mosaic_0001>
module attributes {stable_mosaic.version = 11 : i64} {
  func.func @_glstm_recurrence_kernel(%arg0: i32, %arg1: i32, %arg2: memref<8x2x128xf32, #tpu.memory_space<vmem>>, %arg3: memref<32x128xf32, #tpu.memory_space<vmem>>, %arg4: memref<8x2x32xf32, #tpu.memory_space<vmem>>, %arg5: memref<2x32xf32, #tpu.memory_space<vmem>>, %arg6: memref<2x32xf32, #tpu.memory_space<vmem>>) attributes {dimension_semantics = [#tpu.dimension_semantics<parallel>, #tpu.dimension_semantics<arbitrary>], iteration_bounds = array<i64: 1, 2>, scalar_prefetch = 0 : i64, scratch_operands = 2 : i64, tpu.core_type = #tpu.core_type<tc>, window_params = [{transform_indices = @transform_0, window_bounds = array<i64: 8, 2, 128>}, {pipeline_mode = #tpu.pipeline_mode<synchronous>, transform_indices = @transform_1, window_bounds = array<i64: 32, 128>}, {transform_indices = @transform_2, window_bounds = array<i64: 8, 2, 32>}]} {
    %c0_i32 = arith.constant 0 : i32
    %0 = arith.cmpi eq, %arg1, %c0_i32 : i32
    %1 = arith.extui %0 : i1 to i32
    %c0_i32_0 = arith.constant 0 : i32
    %2 = arith.cmpi ne, %1, %c0_i32_0 : i32
    scf.if %2 {
      %cst_54 = arith.constant 0.000000e+00 : f32
      %216 = vector.broadcast %cst_54 : f32 to vector<2x32xf32>
      %c0_55 = arith.constant 0 : index
      %c0_56 = arith.constant 0 : index
      %217 = vector.load %arg5[%c0_55, %c0_56] : memref<2x32xf32, #tpu.memory_space<vmem>>, vector<2x32xf32>
      tpu.vector_store %arg5[%c0_55, %c0_56], %216 {strides = array<i32>} : memref<2x32xf32, #tpu.memory_space<vmem>>, vector<2x32xf32>,
      %cst_57 = arith.constant 0.000000e+00 : f32
      %218 = vector.broadcast %cst_57 : f32 to vector<2x32xf32>
      %c0_58 = arith.constant 0 : index
      %c0_59 = arith.constant 0 : index
      %219 = vector.load %arg6[%c0_58, %c0_59] : memref<2x32xf32, #tpu.memory_space<vmem>>, vector<2x32xf32>
      tpu.vector_store %arg6[%c0_58, %c0_59], %218 {strides = array<i32>} : memref<2x32xf32, #tpu.memory_space<vmem>>, vector<2x32xf32>,
    } else {
    }
    %c0 = arith.constant 0 : index
    %c0_1 = arith.constant 0 : index
    %3 = vector.load %arg3[%c0, %c0_1] : memref<32x128xf32, #tpu.memory_space<vmem>>, vector<32x128xf32>
    %c0_2 = arith.constant 0 : index
    %c0_3 = arith.constant 0 : index
    %4 = vector.load %arg5[%c0_2, %c0_3] : memref<2x32xf32, #tpu.memory_space<vmem>>, vector<2x32xf32>
    %c0_4 = arith.constant 0 : index
    %c0_5 = arith.constant 0 : index
    %5 = vector.load %arg6[%c0_4, %c0_5] : memref<2x32xf32, #tpu.memory_space<vmem>>, vector<2x32xf32>
    %c0_i32_6 = arith.constant 0 : i32
    %c4_i32 = arith.constant 4 : i32
    %6 = arith.muli %c0_i32_6, %c4_i32 : i32
    %7 = tpu.assume_multiple %6, 4 : i32
    %8 = arith.index_cast %7 : i32 to index
    %c0_7 = arith.constant 0 : index
    %c0_8 = arith.constant 0 : index
    %9 = vector.load %arg2[%8, %c0_7, %c0_8] : memref<8x2x128xf32, #tpu.memory_space<vmem>>, vector<4x2x128xf32>
    %10 = vector.extract_strided_slice %9 {offsets = [0, 0, 0], sizes = [1, 2, 128], strides = [1, 1, 1]} : vector<4x2x128xf32> to vector<1x2x128xf32>
    %11 = vector.shape_cast %10 : vector<1x2x128xf32> to vector<2x128xf32>
    %cst = arith.constant dense<0.000000e+00> : vector<2x128xf32>
    %12 = tpu.matmul %4, %3, %cst {dimension_numbers = #tpu.dot_dimension_numbers<[1], [0], [0], [1], [0, 0, 1, 1], [], []>} : vector<2x32xf32>, vector<32x128xf32>, vector<2x128xf32> -> vector<2x128xf32>
    %13 = arith.addf %11, %12 : vector<2x128xf32>
    %14 = vector.extract_strided_slice %13 {offsets = [0, 0], sizes = [2, 96], strides = [1, 1]} : vector<2x128xf32> to vector<2x96xf32>
    %15 = arith.negf %14 : vector<2x96xf32>
    %16 = math.exp %15 : vector<2x96xf32>
    %cst_9 = arith.constant 1.000000e+00 : f32
    %17 = vector.broadcast %cst_9 : f32 to vector<2x96xf32>
    %18 = arith.addf %17, %16 : vector<2x96xf32>
    %19 = arith.divf %17, %18 : vector<2x96xf32>
    %20 = vector.extract_strided_slice %13 {offsets = [0, 96], sizes = [2, 32], strides = [1, 1]} : vector<2x128xf32> to vector<2x32xf32>
    %21 = math.tanh %20 : vector<2x32xf32>
    %22 = vector.extract_strided_slice %19 {offsets = [0, 32], sizes = [2, 32], strides = [1, 1]} : vector<2x96xf32> to vector<2x32xf32>
    %23 = arith.mulf %22, %5 : vector<2x32xf32>
    %24 = vector.extract_strided_slice %19 {offsets = [0, 0], sizes = [2, 32], strides = [1, 1]} : vector<2x96xf32> to vector<2x32xf32>
    %25 = arith.mulf %24, %21 : vector<2x32xf32>
    %26 = arith.addf %23, %25 : vector<2x32xf32>
    %27 = vector.extract_strided_slice %19 {offsets = [0, 64], sizes = [2, 32], strides = [1, 1]} : vector<2x96xf32> to vector<2x32xf32>
    %28 = math.tanh %26 : vector<2x32xf32>
    %29 = arith.mulf %27, %28 : vector<2x32xf32>
    %c0_i32_10 = arith.constant 0 : i32
    %30 = arith.addi %7, %c0_i32_10 : i32
    %31 = arith.index_cast %30 : i32 to index
    %c0_11 = arith.constant 0 : index
    %c0_12 = arith.constant 0 : index
    %32 = vector.load %arg4[%31, %c0_11, %c0_12] : memref<8x2x32xf32, #tpu.memory_space<vmem>>, vector<1x2x32xf32>
    %33 = vector.shape_cast %32 : vector<1x2x32xf32> to vector<2x32xf32>
    %34 = vector.shape_cast %29 : vector<2x32xf32> to vector<1x2x32xf32>
    tpu.vector_store %arg4[%31, %c0_11, %c0_12], %34 {strides = array<i32>} : memref<8x2x32xf32, #tpu.memory_space<vmem>>, vector<1x2x32xf32>,
    %35 = vector.extract_strided_slice %9 {offsets = [1, 0, 0], sizes = [1, 2, 128], strides = [1, 1, 1]} : vector<4x2x128xf32> to vector<1x2x128xf32>
    %36 = vector.shape_cast %35 : vector<1x2x128xf32> to vector<2x128xf32>
    %cst_13 = arith.constant dense<0.000000e+00> : vector<2x128xf32>
    %37 = tpu.matmul %29, %3, %cst_13 {dimension_numbers = #tpu.dot_dimension_numbers<[1], [0], [0], [1], [0, 0, 1, 1], [], []>} : vector<2x32xf32>, vector<32x128xf32>, vector<2x128xf32> -> vector<2x128xf32>
    %38 = arith.addf %36, %37 : vector<2x128xf32>
    %39 = vector.extract_strided_slice %38 {offsets = [0, 0], sizes = [2, 96], strides = [1, 1]} : vector<2x128xf32> to vector<2x96xf32>
    %40 = arith.negf %39 : vector<2x96xf32>
    %41 = math.exp %40 : vector<2x96xf32>
    %cst_14 = arith.constant 1.000000e+00 : f32
    %42 = vector.broadcast %cst_14 : f32 to vector<2x96xf32>
    %43 = arith.addf %42, %41 : vector<2x96xf32>
    %44 = arith.divf %42, %43 : vector<2x96xf32>
    %45 = vector.extract_strided_slice %38 {offsets = [0, 96], sizes = [2, 32], strides = [1, 1]} : vector<2x128xf32> to vector<2x32xf32>
    %46 = math.tanh %45 : vector<2x32xf32>
    %47 = vector.extract_strided_slice %44 {offsets = [0, 32], sizes = [2, 32], strides = [1, 1]} : vector<2x96xf32> to vector<2x32xf32>
    %48 = arith.mulf %47, %26 : vector<2x32xf32>
    %49 = vector.extract_strided_slice %44 {offsets = [0, 0], sizes = [2, 32], strides = [1, 1]} : vector<2x96xf32> to vector<2x32xf32>
    %50 = arith.mulf %49, %46 : vector<2x32xf32>
    %51 = arith.addf %48, %50 : vector<2x32xf32>
    %52 = vector.extract_strided_slice %44 {offsets = [0, 64], sizes = [2, 32], strides = [1, 1]} : vector<2x96xf32> to vector<2x32xf32>
    %53 = math.tanh %51 : vector<2x32xf32>
    %54 = arith.mulf %52, %53 : vector<2x32xf32>
    %c1_i32 = arith.constant 1 : i32
    %55 = arith.addi %7, %c1_i32 : i32
    %56 = arith.index_cast %55 : i32 to index
    %c0_15 = arith.constant 0 : index
    %c0_16 = arith.constant 0 : index
    %57 = vector.load %arg4[%56, %c0_15, %c0_16] : memref<8x2x32xf32, #tpu.memory_space<vmem>>, vector<1x2x32xf32>
    %58 = vector.shape_cast %57 : vector<1x2x32xf32> to vector<2x32xf32>
    %59 = vector.shape_cast %54 : vector<2x32xf32> to vector<1x2x32xf32>
    tpu.vector_store %arg4[%56, %c0_15, %c0_16], %59 {strides = array<i32>} : memref<8x2x32xf32, #tpu.memory_space<vmem>>, vector<1x2x32xf32>,
    %60 = vector.extract_strided_slice %9 {offsets = [2, 0, 0], sizes = [1, 2, 128], strides = [1, 1, 1]} : vector<4x2x128xf32> to vector<1x2x128xf32>
    %61 = vector.shape_cast %60 : vector<1x2x128xf32> to vector<2x128xf32>
    %cst_17 = arith.constant dense<0.000000e+00> : vector<2x128xf32>
    %62 = tpu.matmul %54, %3, %cst_17 {dimension_numbers = #tpu.dot_dimension_numbers<[1], [0], [0], [1], [0, 0, 1, 1], [], []>} : vector<2x32xf32>, vector<32x128xf32>, vector<2x128xf32> -> vector<2x128xf32>
    %63 = arith.addf %61, %62 : vector<2x128xf32>
    %64 = vector.extract_strided_slice %63 {offsets = [0, 0], sizes = [2, 96], strides = [1, 1]} : vector<2x128xf32> to vector<2x96xf32>
    %65 = arith.negf %64 : vector<2x96xf32>
    %66 = math.exp %65 : vector<2x96xf32>
    %cst_18 = arith.constant 1.000000e+00 : f32
    %67 = vector.broadcast %cst_18 : f32 to vector<2x96xf32>
    %68 = arith.addf %67, %66 : vector<2x96xf32>
    %69 = arith.divf %67, %68 : vector<2x96xf32>
    %70 = vector.extract_strided_slice %63 {offsets = [0, 96], sizes = [2, 32], strides = [1, 1]} : vector<2x128xf32> to vector<2x32xf32>
    %71 = math.tanh %70 : vector<2x32xf32>
    %72 = vector.extract_strided_slice %69 {offsets = [0, 32], sizes = [2, 32], strides = [1, 1]} : vector<2x96xf32> to vector<2x32xf32>
    %73 = arith.mulf %72, %51 : vector<2x32xf32>
    %74 = vector.extract_strided_slice %69 {offsets = [0, 0], sizes = [2, 32], strides = [1, 1]} : vector<2x96xf32> to vector<2x32xf32>
    %75 = arith.mulf %74, %71 : vector<2x32xf32>
    %76 = arith.addf %73, %75 : vector<2x32xf32>
    %77 = vector.extract_strided_slice %69 {offsets = [0, 64], sizes = [2, 32], strides = [1, 1]} : vector<2x96xf32> to vector<2x32xf32>
    %78 = math.tanh %76 : vector<2x32xf32>
    %79 = arith.mulf %77, %78 : vector<2x32xf32>
    %c2_i32 = arith.constant 2 : i32
    %80 = arith.addi %7, %c2_i32 : i32
    %81 = arith.index_cast %80 : i32 to index
    %c0_19 = arith.constant 0 : index
    %c0_20 = arith.constant 0 : index
    %82 = vector.load %arg4[%81, %c0_19, %c0_20] : memref<8x2x32xf32, #tpu.memory_space<vmem>>, vector<1x2x32xf32>
    %83 = vector.shape_cast %82 : vector<1x2x32xf32> to vector<2x32xf32>
    %84 = vector.shape_cast %79 : vector<2x32xf32> to vector<1x2x32xf32>
    tpu.vector_store %arg4[%81, %c0_19, %c0_20], %84 {strides = array<i32>} : memref<8x2x32xf32, #tpu.memory_space<vmem>>, vector<1x2x32xf32>,
    %85 = vector.extract_strided_slice %9 {offsets = [3, 0, 0], sizes = [1, 2, 128], strides = [1, 1, 1]} : vector<4x2x128xf32> to vector<1x2x128xf32>
    %86 = vector.shape_cast %85 : vector<1x2x128xf32> to vector<2x128xf32>
    %cst_21 = arith.constant dense<0.000000e+00> : vector<2x128xf32>
    %87 = tpu.matmul %79, %3, %cst_21 {dimension_numbers = #tpu.dot_dimension_numbers<[1], [0], [0], [1], [0, 0, 1, 1], [], []>} : vector<2x32xf32>, vector<32x128xf32>, vector<2x128xf32> -> vector<2x128xf32>
    %88 = arith.addf %86, %87 : vector<2x128xf32>
    %89 = vector.extract_strided_slice %88 {offsets = [0, 0], sizes = [2, 96], strides = [1, 1]} : vector<2x128xf32> to vector<2x96xf32>
    %90 = arith.negf %89 : vector<2x96xf32>
    %91 = math.exp %90 : vector<2x96xf32>
    %cst_22 = arith.constant 1.000000e+00 : f32
    %92 = vector.broadcast %cst_22 : f32 to vector<2x96xf32>
    %93 = arith.addf %92, %91 : vector<2x96xf32>
    %94 = arith.divf %92, %93 : vector<2x96xf32>
    %95 = vector.extract_strided_slice %88 {offsets = [0, 96], sizes = [2, 32], strides = [1, 1]} : vector<2x128xf32> to vector<2x32xf32>
    %96 = math.tanh %95 : vector<2x32xf32>
    %97 = vector.extract_strided_slice %94 {offsets = [0, 32], sizes = [2, 32], strides = [1, 1]} : vector<2x96xf32> to vector<2x32xf32>
    %98 = arith.mulf %97, %76 : vector<2x32xf32>
    %99 = vector.extract_strided_slice %94 {offsets = [0, 0], sizes = [2, 32], strides = [1, 1]} : vector<2x96xf32> to vector<2x32xf32>
    %100 = arith.mulf %99, %96 : vector<2x32xf32>
    %101 = arith.addf %98, %100 : vector<2x32xf32>
    %102 = vector.extract_strided_slice %94 {offsets = [0, 64], sizes = [2, 32], strides = [1, 1]} : vector<2x96xf32> to vector<2x32xf32>
    %103 = math.tanh %101 : vector<2x32xf32>
    %104 = arith.mulf %102, %103 : vector<2x32xf32>
    %c3_i32 = arith.constant 3 : i32
    %105 = arith.addi %7, %c3_i32 : i32
    %106 = arith.index_cast %105 : i32 to index
    %c0_23 = arith.constant 0 : index
    %c0_24 = arith.constant 0 : index
    %107 = vector.load %arg4[%106, %c0_23, %c0_24] : memref<8x2x32xf32, #tpu.memory_space<vmem>>, vector<1x2x32xf32>
    %108 = vector.shape_cast %107 : vector<1x2x32xf32> to vector<2x32xf32>
    %109 = vector.shape_cast %104 : vector<2x32xf32> to vector<1x2x32xf32>
    tpu.vector_store %arg4[%106, %c0_23, %c0_24], %109 {strides = array<i32>} : memref<8x2x32xf32, #tpu.memory_space<vmem>>, vector<1x2x32xf32>,
    %c1_i32_25 = arith.constant 1 : i32
    %c4_i32_26 = arith.constant 4 : i32
    %110 = arith.muli %c1_i32_25, %c4_i32_26 : i32
    %111 = tpu.assume_multiple %110, 4 : i32
    %112 = arith.index_cast %111 : i32 to index
    %c0_27 = arith.constant 0 : index
    %c0_28 = arith.constant 0 : index
    %113 = vector.load %arg2[%112, %c0_27, %c0_28] : memref<8x2x128xf32, #tpu.memory_space<vmem>>, vector<4x2x128xf32>
    %114 = vector.extract_strided_slice %113 {offsets = [0, 0, 0], sizes = [1, 2, 128], strides = [1, 1, 1]} : vector<4x2x128xf32> to vector<1x2x128xf32>
    %115 = vector.shape_cast %114 : vector<1x2x128xf32> to vector<2x128xf32>
    %cst_29 = arith.constant dense<0.000000e+00> : vector<2x128xf32>
    %116 = tpu.matmul %104, %3, %cst_29 {dimension_numbers = #tpu.dot_dimension_numbers<[1], [0], [0], [1], [0, 0, 1, 1], [], []>} : vector<2x32xf32>, vector<32x128xf32>, vector<2x128xf32> -> vector<2x128xf32>
    %117 = arith.addf %115, %116 : vector<2x128xf32>
    %118 = vector.extract_strided_slice %117 {offsets = [0, 0], sizes = [2, 96], strides = [1, 1]} : vector<2x128xf32> to vector<2x96xf32>
    %119 = arith.negf %118 : vector<2x96xf32>
    %120 = math.exp %119 : vector<2x96xf32>
    %cst_30 = arith.constant 1.000000e+00 : f32
    %121 = vector.broadcast %cst_30 : f32 to vector<2x96xf32>
    %122 = arith.addf %121, %120 : vector<2x96xf32>
    %123 = arith.divf %121, %122 : vector<2x96xf32>
    %124 = vector.extract_strided_slice %117 {offsets = [0, 96], sizes = [2, 32], strides = [1, 1]} : vector<2x128xf32> to vector<2x32xf32>
    %125 = math.tanh %124 : vector<2x32xf32>
    %126 = vector.extract_strided_slice %123 {offsets = [0, 32], sizes = [2, 32], strides = [1, 1]} : vector<2x96xf32> to vector<2x32xf32>
    %127 = arith.mulf %126, %101 : vector<2x32xf32>
    %128 = vector.extract_strided_slice %123 {offsets = [0, 0], sizes = [2, 32], strides = [1, 1]} : vector<2x96xf32> to vector<2x32xf32>
    %129 = arith.mulf %128, %125 : vector<2x32xf32>
    %130 = arith.addf %127, %129 : vector<2x32xf32>
    %131 = vector.extract_strided_slice %123 {offsets = [0, 64], sizes = [2, 32], strides = [1, 1]} : vector<2x96xf32> to vector<2x32xf32>
    %132 = math.tanh %130 : vector<2x32xf32>
    %133 = arith.mulf %131, %132 : vector<2x32xf32>
    %c0_i32_31 = arith.constant 0 : i32
    %134 = arith.addi %111, %c0_i32_31 : i32
    %135 = arith.index_cast %134 : i32 to index
    %c0_32 = arith.constant 0 : index
    %c0_33 = arith.constant 0 : index
    %136 = vector.load %arg4[%135, %c0_32, %c0_33] : memref<8x2x32xf32, #tpu.memory_space<vmem>>, vector<1x2x32xf32>
    %137 = vector.shape_cast %136 : vector<1x2x32xf32> to vector<2x32xf32>
    %138 = vector.shape_cast %133 : vector<2x32xf32> to vector<1x2x32xf32>
    tpu.vector_store %arg4[%135, %c0_32, %c0_33], %138 {strides = array<i32>} : memref<8x2x32xf32, #tpu.memory_space<vmem>>, vector<1x2x32xf32>,
    %139 = vector.extract_strided_slice %113 {offsets = [1, 0, 0], sizes = [1, 2, 128], strides = [1, 1, 1]} : vector<4x2x128xf32> to vector<1x2x128xf32>
    %140 = vector.shape_cast %139 : vector<1x2x128xf32> to vector<2x128xf32>
    %cst_34 = arith.constant dense<0.000000e+00> : vector<2x128xf32>
    %141 = tpu.matmul %133, %3, %cst_34 {dimension_numbers = #tpu.dot_dimension_numbers<[1], [0], [0], [1], [0, 0, 1, 1], [], []>} : vector<2x32xf32>, vector<32x128xf32>, vector<2x128xf32> -> vector<2x128xf32>
    %142 = arith.addf %140, %141 : vector<2x128xf32>
    %143 = vector.extract_strided_slice %142 {offsets = [0, 0], sizes = [2, 96], strides = [1, 1]} : vector<2x128xf32> to vector<2x96xf32>
    %144 = arith.negf %143 : vector<2x96xf32>
    %145 = math.exp %144 : vector<2x96xf32>
    %cst_35 = arith.constant 1.000000e+00 : f32
    %146 = vector.broadcast %cst_35 : f32 to vector<2x96xf32>
    %147 = arith.addf %146, %145 : vector<2x96xf32>
    %148 = arith.divf %146, %147 : vector<2x96xf32>
    %149 = vector.extract_strided_slice %142 {offsets = [0, 96], sizes = [2, 32], strides = [1, 1]} : vector<2x128xf32> to vector<2x32xf32>
    %150 = math.tanh %149 : vector<2x32xf32>
    %151 = vector.extract_strided_slice %148 {offsets = [0, 32], sizes = [2, 32], strides = [1, 1]} : vector<2x96xf32> to vector<2x32xf32>
    %152 = arith.mulf %151, %130 : vector<2x32xf32>
    %153 = vector.extract_strided_slice %148 {offsets = [0, 0], sizes = [2, 32], strides = [1, 1]} : vector<2x96xf32> to vector<2x32xf32>
    %154 = arith.mulf %153, %150 : vector<2x32xf32>
    %155 = arith.addf %152, %154 : vector<2x32xf32>
    %156 = vector.extract_strided_slice %148 {offsets = [0, 64], sizes = [2, 32], strides = [1, 1]} : vector<2x96xf32> to vector<2x32xf32>
    %157 = math.tanh %155 : vector<2x32xf32>
    %158 = arith.mulf %156, %157 : vector<2x32xf32>
    %c1_i32_36 = arith.constant 1 : i32
    %159 = arith.addi %111, %c1_i32_36 : i32
    %160 = arith.index_cast %159 : i32 to index
    %c0_37 = arith.constant 0 : index
    %c0_38 = arith.constant 0 : index
    %161 = vector.load %arg4[%160, %c0_37, %c0_38] : memref<8x2x32xf32, #tpu.memory_space<vmem>>, vector<1x2x32xf32>
    %162 = vector.shape_cast %161 : vector<1x2x32xf32> to vector<2x32xf32>
    %163 = vector.shape_cast %158 : vector<2x32xf32> to vector<1x2x32xf32>
    tpu.vector_store %arg4[%160, %c0_37, %c0_38], %163 {strides = array<i32>} : memref<8x2x32xf32, #tpu.memory_space<vmem>>, vector<1x2x32xf32>,
    %164 = vector.extract_strided_slice %113 {offsets = [2, 0, 0], sizes = [1, 2, 128], strides = [1, 1, 1]} : vector<4x2x128xf32> to vector<1x2x128xf32>
    %165 = vector.shape_cast %164 : vector<1x2x128xf32> to vector<2x128xf32>
    %cst_39 = arith.constant dense<0.000000e+00> : vector<2x128xf32>
    %166 = tpu.matmul %158, %3, %cst_39 {dimension_numbers = #tpu.dot_dimension_numbers<[1], [0], [0], [1], [0, 0, 1, 1], [], []>} : vector<2x32xf32>, vector<32x128xf32>, vector<2x128xf32> -> vector<2x128xf32>
    %167 = arith.addf %165, %166 : vector<2x128xf32>
    %168 = vector.extract_strided_slice %167 {offsets = [0, 0], sizes = [2, 96], strides = [1, 1]} : vector<2x128xf32> to vector<2x96xf32>
    %169 = arith.negf %168 : vector<2x96xf32>
    %170 = math.exp %169 : vector<2x96xf32>
    %cst_40 = arith.constant 1.000000e+00 : f32
    %171 = vector.broadcast %cst_40 : f32 to vector<2x96xf32>
    %172 = arith.addf %171, %170 : vector<2x96xf32>
    %173 = arith.divf %171, %172 : vector<2x96xf32>
    %174 = vector.extract_strided_slice %167 {offsets = [0, 96], sizes = [2, 32], strides = [1, 1]} : vector<2x128xf32> to vector<2x32xf32>
    %175 = math.tanh %174 : vector<2x32xf32>
    %176 = vector.extract_strided_slice %173 {offsets = [0, 32], sizes = [2, 32], strides = [1, 1]} : vector<2x96xf32> to vector<2x32xf32>
    %177 = arith.mulf %176, %155 : vector<2x32xf32>
    %178 = vector.extract_strided_slice %173 {offsets = [0, 0], sizes = [2, 32], strides = [1, 1]} : vector<2x96xf32> to vector<2x32xf32>
    %179 = arith.mulf %178, %175 : vector<2x32xf32>
    %180 = arith.addf %177, %179 : vector<2x32xf32>
    %181 = vector.extract_strided_slice %173 {offsets = [0, 64], sizes = [2, 32], strides = [1, 1]} : vector<2x96xf32> to vector<2x32xf32>
    %182 = math.tanh %180 : vector<2x32xf32>
    %183 = arith.mulf %181, %182 : vector<2x32xf32>
    %c2_i32_41 = arith.constant 2 : i32
    %184 = arith.addi %111, %c2_i32_41 : i32
    %185 = arith.index_cast %184 : i32 to index
    %c0_42 = arith.constant 0 : index
    %c0_43 = arith.constant 0 : index
    %186 = vector.load %arg4[%185, %c0_42, %c0_43] : memref<8x2x32xf32, #tpu.memory_space<vmem>>, vector<1x2x32xf32>
    %187 = vector.shape_cast %186 : vector<1x2x32xf32> to vector<2x32xf32>
    %188 = vector.shape_cast %183 : vector<2x32xf32> to vector<1x2x32xf32>
    tpu.vector_store %arg4[%185, %c0_42, %c0_43], %188 {strides = array<i32>} : memref<8x2x32xf32, #tpu.memory_space<vmem>>, vector<1x2x32xf32>,
    %189 = vector.extract_strided_slice %113 {offsets = [3, 0, 0], sizes = [1, 2, 128], strides = [1, 1, 1]} : vector<4x2x128xf32> to vector<1x2x128xf32>
    %190 = vector.shape_cast %189 : vector<1x2x128xf32> to vector<2x128xf32>
    %cst_44 = arith.constant dense<0.000000e+00> : vector<2x128xf32>
    %191 = tpu.matmul %183, %3, %cst_44 {dimension_numbers = #tpu.dot_dimension_numbers<[1], [0], [0], [1], [0, 0, 1, 1], [], []>} : vector<2x32xf32>, vector<32x128xf32>, vector<2x128xf32> -> vector<2x128xf32>
    %192 = arith.addf %190, %191 : vector<2x128xf32>
    %193 = vector.extract_strided_slice %192 {offsets = [0, 0], sizes = [2, 96], strides = [1, 1]} : vector<2x128xf32> to vector<2x96xf32>
    %194 = arith.negf %193 : vector<2x96xf32>
    %195 = math.exp %194 : vector<2x96xf32>
    %cst_45 = arith.constant 1.000000e+00 : f32
    %196 = vector.broadcast %cst_45 : f32 to vector<2x96xf32>
    %197 = arith.addf %196, %195 : vector<2x96xf32>
    %198 = arith.divf %196, %197 : vector<2x96xf32>
    %199 = vector.extract_strided_slice %192 {offsets = [0, 96], sizes = [2, 32], strides = [1, 1]} : vector<2x128xf32> to vector<2x32xf32>
    %200 = math.tanh %199 : vector<2x32xf32>
    %201 = vector.extract_strided_slice %198 {offsets = [0, 32], sizes = [2, 32], strides = [1, 1]} : vector<2x96xf32> to vector<2x32xf32>
    %202 = arith.mulf %201, %180 : vector<2x32xf32>
    %203 = vector.extract_strided_slice %198 {offsets = [0, 0], sizes = [2, 32], strides = [1, 1]} : vector<2x96xf32> to vector<2x32xf32>
    %204 = arith.mulf %203, %200 : vector<2x32xf32>
    %205 = arith.addf %202, %204 : vector<2x32xf32>
    %206 = vector.extract_strided_slice %198 {offsets = [0, 64], sizes = [2, 32], strides = [1, 1]} : vector<2x96xf32> to vector<2x32xf32>
    %207 = math.tanh %205 : vector<2x32xf32>
    %208 = arith.mulf %206, %207 : vector<2x32xf32>
    %c3_i32_46 = arith.constant 3 : i32
    %209 = arith.addi %111, %c3_i32_46 : i32
    %210 = arith.index_cast %209 : i32 to index
    %c0_47 = arith.constant 0 : index
    %c0_48 = arith.constant 0 : index
    %211 = vector.load %arg4[%210, %c0_47, %c0_48] : memref<8x2x32xf32, #tpu.memory_space<vmem>>, vector<1x2x32xf32>
    %212 = vector.shape_cast %211 : vector<1x2x32xf32> to vector<2x32xf32>
    %213 = vector.shape_cast %208 : vector<2x32xf32> to vector<1x2x32xf32>
    tpu.vector_store %arg4[%210, %c0_47, %c0_48], %213 {strides = array<i32>} : memref<8x2x32xf32, #tpu.memory_space<vmem>>, vector<1x2x32xf32>,
    %c2_i32_49 = arith.constant 2 : i32
    %c0_50 = arith.constant 0 : index
    %c0_51 = arith.constant 0 : index
    %214 = vector.load %arg5[%c0_50, %c0_51] : memref<2x32xf32, #tpu.memory_space<vmem>>, vector<2x32xf32>
    tpu.vector_store %arg5[%c0_50, %c0_51], %208 {strides = array<i32>} : memref<2x32xf32, #tpu.memory_space<vmem>>, vector<2x32xf32>,
    %c0_52 = arith.constant 0 : index
    %c0_53 = arith.constant 0 : index
    %215 = vector.load %arg6[%c0_52, %c0_53] : memref<2x32xf32, #tpu.memory_space<vmem>>, vector<2x32xf32>
    tpu.vector_store %arg6[%c0_52, %c0_53], %205 {strides = array<i32>} : memref<2x32xf32, #tpu.memory_space<vmem>>, vector<2x32xf32>,
    return
  }
  func.func @transform_0(%arg0: i32, %arg1: i32) -> (i32, i32, i32) {
    %c0_i32 = arith.constant 0 : i32
    %c0_i32_0 = arith.constant 0 : i32
    return %arg1, %arg0, %c0_i32 : i32, i32, i32
  }
  func.func @transform_1(%arg0: i32, %arg1: i32) -> (i32, i32) {
    %c0_i32 = arith.constant 0 : i32
    %c0_i32_0 = arith.constant 0 : i32
    %c0_i32_1 = arith.constant 0 : i32
    return %c0_i32, %c0_i32_0 : i32, i32
  }
  func.func @transform_2(%arg0: i32, %arg1: i32) -> (i32, i32, i32) {
    %c0_i32 = arith.constant 0 : i32
    %c0_i32_0 = arith.constant 0 : i32
    return %arg1, %arg0, %c0_i32 : i32, i32, i32
  }
}

</mosaic_0001>

<bundles_post_ra>
// kernel: glstm_forward.1
= control target key start
LH: loop header
LB: loop body
LE: loop exit
PB: predicated region body
PF: predicated region fallthrough
CT: control target
= control target key end

     0   :  { %s1444_s9 = smov 0   ;;  %s1446_s10 = smov 0   ;;  %s1648_s0 = inlined_call_operand.vmem [shape: f32[16,2,128], index: 0, kind: input, shape index: {}]   ;;  %s1649_s1 = inlined_call_operand.vmem [shape: f32[32,128], index: 1, kind: input, shape index: {}]   ;;  %s1650_s2 = inlined_call_operand.vmem [shape: f32[16,2,32], index: 2, kind: output, shape index: {}]  }
   0x1   :  { %s1448_s11 = smov 0  }
   0x2 LB: > { %s21_s12 = sadd.s32 1, %s1417_s10  ;;  %p1142_p0 = scmp.ge.s32.totalorder %s1421_s11, 1  ;;  %s1421_s11 = sphi %s1448_s11, %s12_s11   ;;  %s1417_s10 = sphi %s1446_s10, %s1652_s10   ;;  %s1413_s9 = sphi %s1444_s9, %s1651_s9  }
   0x3   : > { %p22_p1 = scmp.ge.s32.totalorder %s21_s12, 2  ;;  %p132_p2 = scmp.lt.s32.totalorder %s1421_s11, 3 }
   0x5   : > { %s1654_s12 = smov (%p22_p1, %s21_s12), 0  ;;  %p133_p3 = pnand %p1142_p0, %p132_p2 }
   0x6   : > { %s1143_s13 = sshll.u32 (!%p133_p3), %s1413_s9, 3  ;;  %p1147_p5 = scmp.ne.s32.totalorder (!%p133_p3), %s1413_s9, 0 }
   0x7   : > { %136 = sbr.rel (%p133_p3) target bundleno = 5541 (0x15a5), region = 28  ;;  %p161_p4 = scmp.lt.s32.totalorder (!%p133_p3), %s1143_s13, 15 }
   0xc   : > { %s1656_s13 = smov (!%p161_p4, %s1143_s13), 15  ;;  %181 = sbr.rel (%p1147_p5) target bundleno = 19 (0x13), region = 32 }
   0xd   : > { %s1144_s14 = sshll.u32 %s1656_s13, 1 }
   0xe   : > { %s1465_s17 = scalar_lea.vmem %s1648_s0, %s1144_s14  ;;  %s1470_s20 = scalar_lea.vmem %s1650_s2, %s1144_s14 }
  0x11   : > { %vm182_vm0 = vcmask 254976   ;;  %v1423_v0 = vmov 0.0  }
  0x12   : > { %183 = vst.msk [vmem:[#allocation2] sm:$0x3] %vm182_vm0, %v1423_v0  ;;  %184 = vst.msk [vmem:[#allocation3] sm:$0x3] %vm182_vm0, %v1423_v0 }
  0x13 PF: > { %v1475_v1 = vld [vmem:[%s1649_s1 + $0x18] sm:$0xff]  ;;  %v1424_v2 = vmov 0.0   ;;  %v1481_v3 = vld [vmem:[%s1649_s1 + $0x10] sm:$0xff]  ;;  %vm1425_vm1 = vmmov 0   ;;  %v1491_v4 = vld [vmem:[%s1649_s1 + $0x8] sm:$0xff]  ;;  %vm197_vm2 = vcmask 261120  }
  0x14   : > { %1217 = vmatprep.subr.mxu0 %v1424_v2  ;;  %1225 = vmatprep.mubr.msk.f32.mxu0 %vm1425_vm1, %v1424_v2  ;;  %v1500_v5 = vld [vmem:[%s1649_s1] sm:$0xff]  ;;  %s1426_s29 = smov 32   ;;  %s1427_s30 = smov 64   ;;  %vm305_vm3 = vcmask 254976  }
  0x15   : > { %1218 = vmatpush3.msra.mxu0 %v1475_v1  ;;  %1228 = vmatprep.subr.mxu1 %v1424_v2  ;;  %v193_v7 = vld [vmem:[%s1465_s17] sm:$0x3]  ;;  %v194_v27 = vld [vmem:[%s1465_s17 + $0x2] sm:$0x3]  ;;  %v195_v45 = vld [vmem:[%s1465_s17 + $0x4] sm:$0x3] }
  0x16   : > { %1219 = vmatprep.subr.mxu0 %v1424_v2  ;;  %1229 = vmatpush3.msra.mxu1 %v1475_v1  ;;  %v196_v63 = vld [vmem:[%s1465_s17 + $0x6] sm:$0x3]  ;;  %s1428_s3 = smov 96  }
  0x17   : > { %1220 = vmatpush3.msra.mxu0 %v1481_v3  ;;  %1230 = vmatprep.subr.mxu1 %v1424_v2 }
  0x18   : > { %1221 = vmatprep.subr.mxu0 %v1424_v2  ;;  %1231 = vmatpush3.msra.mxu1 %v1481_v3 }
  0x19   : > { %1222 = vmatpush3.msra.mxu0 %v1491_v4  ;;  %v189_v6 = vld [vmem:[#allocation2] sm:$0x3]  ;;  %1232 = vmatprep.subr.mxu1 %v1424_v2  ;;  %v190_v12 = vld [vmem:[#allocation3] sm:$0x3] }
  0x1a   : > { %1223 = vmatprep.subr.mxu0 %v1424_v2  ;;  %1233 = vmatpush3.msra.mxu1 %v1491_v4 }
  0x1b   : > { %1224 = vmatpush3.msra.mxu0 %v1500_v5  ;;  %1234 = vmatprep.subr.mxu1 %v1424_v2 }
  0x1c   : > { %1226 = vmatmul.mubr.msk.f32.vlgmr.msra.gmra.mxu0 %vm197_vm2, %v189_v6  ;;  %1235 = vmatpush3.msra.mxu1 %v1500_v5 }
  0x1d   : > { %1236 = vmatprep.mubr.msk.f32.mxu1 %vm1425_vm1, %v1424_v2  ;;  %1239 = vmatprep.subr.mxu0 %v1424_v2 }
  0x1e   : > { %1240 = vmatpush3.msra.mxu0 %v1475_v1  ;;  %1247 = vmatprep.mubr.msk.f32.mxu0 %vm1425_vm1, %v1424_v2 }
  0x1f   : > { %1241 = vmatprep.subr.mxu0 %v1424_v2  ;;  %1250 = vmatprep.subr.mxu1 %v1424_v2 }
  0x20   : > { %1242 = vmatpush3.msra.mxu0 %v1481_v3 }
  0x21   : > { %1243 = vmatprep.subr.mxu0 %v1424_v2 }
  0x22   : > { %1244 = vmatpush3.msra.mxu0 %v1491_v4 }
  0x23   : > { %1245 = vmatprep.subr.mxu0 %v1424_v2 }
  0x24   : > { %1246 = vmatpush3.msra.mxu0 %v1500_v5 }
  0x25   : > { %1261 = vmatprep.subr.mxu0 %v1424_v2 }
  0xdc   : > { %v267_v8 = vpop.f32.mrf.mxu0 }
  0xdd   : > { %v271_v9 = vadd.f32 %v267_v8, %v193_v7 }
  0xde   : > { %v1227_v10 = vpop.f32.mrf.mxu0 }
  0xdf   : > { %1335 = vtanh.f32 %v271_v9  ;;  %v1149_v13 = vmul.f32 -1.442695, %v271_v9 }
  0xe1   : > { %1337 = vpow2.f32 %v1149_v13 }
  0xec   : > { %v1336_v11 = vpop.eup %1335 }
  0xed   : > { %285 = vrot.lane.b32.xlu0 %v1336_v11, %s1426_s29 }
  0xee   : > { %v1338_v14 = vpop.eup %1337 }
  0xef   : > { %v275_v15 = vadd.f32 1.0, %v1338_v14 }
  0xf1   : > { %280 = vrot.lane.b32.xlu0 %v190_v12, %s1426_s29  ;;  %1339 = vrcp.f32 %v275_v15 }
  0xfe   : > { %v1340_v16 = vpop.eup %1339 }
 0x15f   : > { %v286_v17 = vpop.permute.xlu0 %285 }
 0x160   : > { %v288_v18 = vmul.f32 %v1340_v16, %v286_v17 }
 0x162   : > { %290 = vrot.lane.b32.xlu1 %v288_v18, %s1426_s29 }
 0x163   : > { %v281_v19 = vpop.permute.xlu0 %280 }
 0x164   : > { %v283_v20 = vmul.f32 %v1340_v16, %v281_v19 }
 0x1d4   : > { %v291_v21 = vpop.permute.xlu1 %290 }
 0x1d5   : > { %v293_v22 = vadd.f32 %v291_v21, %v283_v20 }
 0x1d7   : > { %1341 = vtanh.f32 %v293_v22 }
 0x1e4   : > { %v1342_v23 = vpop.eup %1341 }
 0x1e5   : > { %296 = vrot.lane.b32.xlu1 %v1342_v23, %s1426_s29 }
 0x257   : > { %v297_v24 = vpop.permute.xlu1 %296 }
 0x258   : > { %v299_v25 = vmul.f32 %v1340_v16, %v297_v24 }
 0x25a   : > { %301 = vrot.lane.b32.xlu0 %v299_v25, %s1427_s30 }
 0x2cc   : > { %v302_v26 = vpop.permute.xlu0 %301 }
 0x2cd   : > { %306 = vst.msk [vmem:[%s1470_s20] sm:$0x3] %vm305_vm3, %v302_v26  ;;  %1237 = vmatmul.mubr.msk.f32.vlgmr.msra.gmra.mxu1 %vm197_vm2, %v302_v26 }
 0x2ce   : > { %1251 = vmatpush3.msra.mxu1 %v1475_v1  ;;  %1258 = vmatprep.mubr.msk.f32.mxu1 %vm1425_vm1, %v1424_v2 }
 0x2cf   : > { %1252 = vmatprep.subr.mxu1 %v1424_v2 }
 0x2d0   : > { %1253 = vmatpush3.msra.mxu1 %v1481_v3 }
 0x2d1   : > { %1254 = vmatprep.subr.mxu1 %v1424_v2 }
 0x2d2   : > { %1255 = vmatpush3.msra.mxu1 %v1491_v4 }
 0x2d3   : > { %1256 = vmatprep.subr.mxu1 %v1424_v2 }
 0x2d4   : > { %1257 = vmatpush3.msra.mxu1 %v1500_v5 }
 0x2d5   : > { %1272 = vmatprep.subr.mxu1 %v1424_v2 }
 0x38d   : > { %v375_v28 = vpop.f32.mrf.mxu1 }
 0x38e   : > { %v379_v29 = vadd.f32 %v375_v28, %v194_v27 }
 0x38f   : > { %v1238_v30 = vpop.f32.mrf.mxu1 }
 0x390   : > { %1343 = vtanh.f32 %v379_v29  ;;  %v1151_v32 = vmul.f32 -1.442695, %v379_v29 }
 0x392   : > { %1345 = vpow2.f32 %v1151_v32 }
 0x39d   : > { %v1344_v31 = vpop.eup %1343 }
 0x39e   : > { %389 = vrot.lane.b32.xlu1 %v1344_v31, %s1426_s29 }
 0x39f   : > { %v1346_v33 = vpop.eup %1345 }
 0x3a0   : > { %v383_v34 = vadd.f32 1.0, %v1346_v33 }
 0x3a2   : > { %1347 = vrcp.f32 %v383_v34 }
 0x3af   : > { %v1348_v35 = vpop.eup %1347 }
 0x3b0   : > { %v387_v38 = vmul.f32 %v1348_v35, %v293_v22  ;;  %v1159_v22 = vld [vmem:[%s1465_s17 + $0x8] sm:$0x3] }
 0x410   : > { %v390_v36 = vpop.permute.xlu1 %389 }
 0x411   : > { %v392_v37 = vmul.f32 %v1348_v35, %v390_v36 }
 0x413   : > { %394 = vrot.lane.b32.xlu0 %v392_v37, %s1426_s29 }
 0x485   : > { %v395_v39 = vpop.permute.xlu0 %394 }
 0x486   : > { %v397_v40 = vadd.f32 %v395_v39, %v387_v38 }
 0x488   : > { %1349 = vtanh.f32 %v397_v40 }
 0x495   : > { %v1350_v41 = vpop.eup %1349 }
 0x496   : > { %400 = vrot.lane.b32.xlu1 %v1350_v41, %s1426_s29 }
 0x508   : > { %v401_v42 = vpop.permute.xlu1 %400 }
 0x509   : > { %v403_v43 = vmul.f32 %v1348_v35, %v401_v42 }
 0x50b   : > { %406 = vrot.lane.b32.xlu0 %v403_v43, %s1427_s30 }
 0x57d   : > { %v407_v44 = vpop.permute.xlu0 %406 }
 0x57e   : > { %1152 = vst.msk [vmem:[%s1470_s20 + $0x2] sm:$0x3] %vm305_vm3, %v407_v44  ;;  %1248 = vmatmul.mubr.msk.f32.vlgmr.msra.gmra.mxu0 %vm197_vm2, %v407_v44 }
 0x57f   : > { %1262 = vmatpush3.msra.mxu0 %v1475_v1  ;;  %1269 = vmatprep.mubr.msk.f32.mxu0 %vm1425_vm1, %v1424_v2 }
 0x580   : > { %1263 = vmatprep.subr.mxu0 %v1424_v2 }
 0x581   : > { %1264 = vmatpush3.msra.mxu0 %v1481_v3 }
 0x582   : > { %1265 = vmatprep.subr.mxu0 %v1424_v2 }
 0x583   : > { %1266 = vmatpush3.msra.mxu0 %v1491_v4 }
 0x584   : > { %1267 = vmatprep.subr.mxu0 %v1424_v2 }
 0x585   : > { %1268 = vmatpush3.msra.mxu0 %v1500_v5 }
 0x586   : > { %1283 = vmatprep.subr.mxu0 %v1424_v2 }
 0x63e   : > { %v480_v46 = vpop.f32.mrf.mxu0 }
 0x63f   : > { %v484_v47 = vadd.f32 %v480_v46, %v195_v45 }
 0x640   : > { %v1249_v48 = vpop.f32.mrf.mxu0 }
 0x641   : > { %1351 = vtanh.f32 %v484_v47  ;;  %v1154_v50 = vmul.f32 -1.442695, %v484_v47 }
 0x643   : > { %1353 = vpow2.f32 %v1154_v50 }
 0x64e   : > { %v1352_v49 = vpop.eup %1351 }
 0x64f   : > { %494 = vrot.lane.b32.xlu1 %v1352_v49, %s1426_s29 }
 0x650   : > { %v1354_v51 = vpop.eup %1353 }
 0x651   : > { %v488_v52 = vadd.f32 1.0, %v1354_v51 }
 0x653   : > { %1355 = vrcp.f32 %v488_v52 }
 0x660   : > { %v1356_v53 = vpop.eup %1355 }
 0x661   : > { %v492_v56 = vmul.f32 %v1356_v53, %v397_v40  ;;  %v1160_v40 = vld [vmem:[%s1465_s17 + $0xa] sm:$0x3] }
 0x6c1   : > { %v495_v54 = vpop.permute.xlu1 %494 }
 0x6c2   : > { %v497_v55 = vmul.f32 %v1356_v53, %v495_v54 }
 0x6c4   : > { %499 = vrot.lane.b32.xlu0 %v497_v55, %s1426_s29 }
 0x736   : > { %v500_v57 = vpop.permute.xlu0 %499 }
 0x737   : > { %v502_v58 = vadd.f32 %v500_v57, %v492_v56 }
 0x739   : > { %1357 = vtanh.f32 %v502_v58 }
 0x746   : > { %v1358_v59 = vpop.eup %1357 }
 0x747   : > { %505 = vrot.lane.b32.xlu1 %v1358_v59, %s1426_s29 }
 0x7b9   : > { %v506_v60 = vpop.permute.xlu1 %505 }
 0x7ba   : > { %v508_v61 = vmul.f32 %v1356_v53, %v506_v60  ;;  %v1161_v53 = vld [vmem:[%s1465_s17 + $0xc] sm:$0x3] }
 0x7bc   : > { %511 = vrot.lane.b32.xlu0 %v508_v61, %s1427_s30 }
 0x82e   : > { %v512_v62 = vpop.permute.xlu0 %511 }
 0x82f   : > { %1155 = vst.msk [vmem:[%s1470_s20 + $0x4] sm:$0x3] %vm305_vm3, %v512_v62  ;;  %1259 = vmatmul.mubr.msk.f32.vlgmr.msra.gmra.mxu1 %vm197_vm2, %v512_v62 }
 0x830   : > { %1273 = vmatpush3.msra.mxu1 %v1475_v1  ;;  %1280 = vmatprep.mubr.msk.f32.mxu1 %vm1425_vm1, %v1424_v2 }
 0x831   : > { %1274 = vmatprep.subr.mxu1 %v1424_v2 }
 0x832   : > { %1275 = vmatpush3.msra.mxu1 %v1481_v3 }
 0x833   : > { %1276 = vmatprep.subr.mxu1 %v1424_v2 }
 0x834   : > { %1277 = vmatpush3.msra.mxu1 %v1491_v4 }
 0x835   : > { %1278 = vmatprep.subr.mxu1 %v1424_v2 }
 0x836   : > { %1279 = vmatpush3.msra.mxu1 %v1500_v5 }
 0x837   : > { %1294 = vmatprep.subr.mxu1 %v1424_v2 }
 0x8ef   : > { %v585_v0 = vpop.f32.mrf.mxu1 }
 0x8f0   : > { %v589_v6 = vadd.f32 %v585_v0, %v196_v63 }
 0x8f1   : > { %v1260_v7 = vpop.f32.mrf.mxu1 }
 0x8f2   : > { %1359 = vtanh.f32 %v589_v6  ;;  %v1157_v9 = vmul.f32 -1.442695, %v589_v6 }
 0x8f4   : > { %1361 = vpow2.f32 %v1157_v9 }
 0x8ff   : > { %v1360_v8 = vpop.eup %1359 }
 0x900   : > { %599 = vrot.lane.b32.xlu1 %v1360_v8, %s1426_s29 }
 0x901   : > { %v1362_v10 = vpop.eup %1361 }
 0x902   : > { %v593_v11 = vadd.f32 1.0, %v1362_v10 }
 0x904   : > { %1363 = vrcp.f32 %v593_v11 }
 0x911   : > { %v1364_v12 = vpop.eup %1363 }
 0x912   : > { %v597_v15 = vmul.f32 %v1364_v12, %v502_v58 }
 0x972   : > { %v600_v13 = vpop.permute.xlu1 %599 }
 0x973   : > { %v602_v14 = vmul.f32 %v1364_v12, %v600_v13 }
 0x975   : > { %604 = vrot.lane.b32.xlu0 %v602_v14, %s1426_s29 }
 0x9e7   : > { %v605_v16 = vpop.permute.xlu0 %604 }
 0x9e8   : > { %v607_v17 = vadd.f32 %v605_v16, %v597_v15 }
 0x9ea   : > { %1365 = vtanh.f32 %v607_v17 }
 0x9f7   : > { %v1366_v18 = vpop.eup %1365 }
 0x9f8   : > { %610 = vrot.lane.b32.xlu1 %v1366_v18, %s1426_s29 }
 0xa6a   : > { %v611_v19 = vpop.permute.xlu1 %610 }
 0xa6b   : > { %v613_v20 = vmul.f32 %v1364_v12, %v611_v19  ;;  %v1162_v12 = vld [vmem:[%s1465_s17 + $0xe] sm:$0x3] }
 0xa6d   : > { %616 = vrot.lane.b32.xlu0 %v613_v20, %s1427_s30 }
 0xadf   : > { %v617_v21 = vpop.permute.xlu0 %616 }
 0xae0   : > { %1158 = vst.msk [vmem:[%s1470_s20 + $0x6] sm:$0x3] %vm305_vm3, %v617_v21  ;;  %1270 = vmatmul.mubr.msk.f32.vlgmr.msra.gmra.mxu0 %vm197_vm2, %v617_v21 }
 0xae1   : > { %1284 = vmatpush3.msra.mxu0 %v1475_v1  ;;  %1291 = vmatprep.mubr.msk.f32.mxu0 %vm1425_vm1, %v1424_v2 }
 0xae2   : > { %1285 = vmatprep.subr.mxu0 %v1424_v2 }
 0xae3   : > { %1286 = vmatpush3.msra.mxu0 %v1481_v3 }
 0xae4   : > { %1287 = vmatprep.subr.mxu0 %v1424_v2 }
 0xae5   : > { %1288 = vmatpush3.msra.mxu0 %v1491_v4 }
 0xae6   : > { %1289 = vmatprep.subr.mxu0 %v1424_v2 }
 0xae7   : > { %1290 = vmatpush3.msra.mxu0 %v1500_v5 }
 0xba0   : > { %v696_v23 = vpop.f32.mrf.mxu0 }
 0xba1   : > { %v700_v24 = vadd.f32 %v1159_v22, %v696_v23 }
 0xba2   : > { %v1271_v25 = vpop.f32.mrf.mxu0 }
 0xba3   : > { %1367 = vtanh.f32 %v700_v24  ;;  %v1164_v27 = vmul.f32 -1.442695, %v700_v24 }
 0xba5   : > { %1369 = vpow2.f32 %v1164_v27 }
 0xbb0   : > { %v1368_v26 = vpop.eup %1367 }
 0xbb1   : > { %710 = vrot.lane.b32.xlu1 %v1368_v26, %s1426_s29 }
 0xbb2   : > { %v1370_v28 = vpop.eup %1369 }
 0xbb3   : > { %v704_v29 = vadd.f32 1.0, %v1370_v28 }
 0xbb5   : > { %1371 = vrcp.f32 %v704_v29 }
 0xbc2   : > { %v1372_v30 = vpop.eup %1371 }
 0xbc3   : > { %v708_v33 = vmul.f32 %v1372_v30, %v607_v17 }
 0xc23   : > { %v711_v31 = vpop.permute.xlu1 %710 }
 0xc24   : > { %v713_v32 = vmul.f32 %v1372_v30, %v711_v31 }
 0xc26   : > { %715 = vrot.lane.b32.xlu0 %v713_v32, %s1426_s29 }
 0xc98   : > { %v716_v34 = vpop.permute.xlu0 %715 }
 0xc99   : > { %v718_v35 = vadd.f32 %v716_v34, %v708_v33 }
 0xc9b   : > { %1373 = vtanh.f32 %v718_v35 }
 0xca8   : > { %v1374_v36 = vpop.eup %1373 }
 0xca9   : > { %721 = vrot.lane.b32.xlu1 %v1374_v36, %s1426_s29 }
 0xd1b   : > { %v722_v37 = vpop.permute.xlu1 %721 }
 0xd1c   : > { %v724_v38 = vmul.f32 %v1372_v30, %v722_v37 }
 0xd1e   : > { %726 = vrot.lane.b32.xlu0 %v724_v38, %s1427_s30 }
 0xd90   : > { %v727_v39 = vpop.permute.xlu0 %726 }
 0xd91   : > { %1165 = vst.msk [vmem:[%s1470_s20 + $0x8] sm:$0x3] %vm305_vm3, %v727_v39  ;;  %1281 = vmatmul.mubr.msk.f32.vlgmr.msra.gmra.mxu1 %vm197_vm2, %v727_v39 }
 0xd92   : > { %1295 = vmatpush3.msra.mxu1 %v1475_v1  ;;  %1302 = vmatprep.mubr.msk.f32.mxu1 %vm1425_vm1, %v1424_v2 }
 0xd93   : > { %1296 = vmatprep.subr.mxu1 %v1424_v2 }
 0xd94   : > { %1297 = vmatpush3.msra.mxu1 %v1481_v3 }
 0xd95   : > { %1298 = vmatprep.subr.mxu1 %v1424_v2 }
 0xd96   : > { %1299 = vmatpush3.msra.mxu1 %v1491_v4 }
 0xd97   : > { %1300 = vmatprep.subr.mxu1 %v1424_v2 }
 0xd98   : > { %1301 = vmatpush3.msra.mxu1 %v1500_v5 }
 0xe51   : > { %v799_v41 = vpop.f32.mrf.mxu1 }
 0xe52   : > { %v803_v42 = vadd.f32 %v1160_v40, %v799_v41 }
 0xe53   : > { %v1282_v43 = vpop.f32.mrf.mxu1 }
 0xe54   : > { %1375 = vtanh.f32 %v803_v42  ;;  %v1167_v44 = vmul.f32 -1.442695, %v803_v42 }
 0xe56   : > { %1377 = vpow2.f32 %v1167_v44 }
 0xe61   : > { %v1376_v1 = vpop.eup %1375 }
 0xe62   : > { %813 = vrot.lane.b32.xlu1 %v1376_v1, %s1426_s29 }
 0xe63   : > { %v1378_v45 = vpop.eup %1377 }
 0xe64   : > { %v807_v3 = vadd.f32 1.0, %v1378_v45 }
 0xe66   : > { %1379 = vrcp.f32 %v807_v3 }
 0xe73   : > { %v1380_v46 = vpop.eup %1379 }
 0xe74   : > { %v811_v5 = vmul.f32 %v1380_v46, %v718_v35 }
 0xed4   : > { %v814_v4 = vpop.permute.xlu1 %813 }
 0xed5   : > { %v816_v2 = vmul.f32 %v1380_v46, %v814_v4 }
 0xed7   : > { %818 = vrot.lane.b32.xlu0 %v816_v2, %s1426_s29 }
 0xf49   : > { %v819_v47 = vpop.permute.xlu0 %818 }
 0xf4a   : > { %v821_v48 = vadd.f32 %v819_v47, %v811_v5 }
 0xf4c   : > { %1381 = vtanh.f32 %v821_v48 }
 0xf59   : > { %v1382_v49 = vpop.eup %1381 }
 0xf5a   : > { %824 = vrot.lane.b32.xlu1 %v1382_v49, %s1426_s29 }
 0xfcc   : > { %v825_v50 = vpop.permute.xlu1 %824 }
 0xfcd   : > { %v827_v51 = vmul.f32 %v1380_v46, %v825_v50 }
 0xfcf   : > { %830 = vrot.lane.b32.xlu0 %v827_v51, %s1427_s30 }
0x1041   : > { %v831_v52 = vpop.permute.xlu0 %830 }
0x1042   : > { %1168 = vst.msk [vmem:[%s1470_s20 + $0xa] sm:$0x3] %vm305_vm3, %v831_v52  ;;  %1292 = vmatmul.mubr.msk.f32.vlgmr.msra.gmra.mxu0 %vm197_vm2, %v831_v52 }
0x1102   : > { %v904_v54 = vpop.f32.mrf.mxu0 }
0x1103   : > { %v908_v55 = vadd.f32 %v1161_v53, %v904_v54 }
0x1104   : > { %v1293_v56 = vpop.f32.mrf.mxu0 }
0x1105   : > { %1383 = vtanh.f32 %v908_v55  ;;  %v1170_v58 = vmul.f32 -1.442695, %v908_v55 }
0x1107   : > { %1385 = vpow2.f32 %v1170_v58 }
0x1112   : > { %v1384_v57 = vpop.eup %1383 }
0x1113   : > { %918 = vrot.lane.b32.xlu1 %v1384_v57, %s1426_s29 }
0x1114   : > { %v1386_v59 = vpop.eup %1385 }
0x1115   : > { %v912_v60 = vadd.f32 1.0, %v1386_v59 }
0x1117   : > { %1387 = vrcp.f32 %v912_v60 }
0x1124   : > { %v1388_v61 = vpop.eup %1387 }
0x1125   : > { %v916_v0 = vmul.f32 %v1388_v61, %v821_v48 }
0x1185   : > { %v919_v62 = vpop.permute.xlu1 %918 }
0x1186   : > { %v921_v63 = vmul.f32 %v1388_v61, %v919_v62 }
0x1188   : > { %923 = vrot.lane.b32.xlu0 %v921_v63, %s1426_s29 }
0x11fa   : > { %v924_v6 = vpop.permute.xlu0 %923 }
0x11fb   : > { %v926_v7 = vadd.f32 %v924_v6, %v916_v0 }
0x11fd   : > { %1389 = vtanh.f32 %v926_v7 }
0x120a   : > { %v1390_v8 = vpop.eup %1389 }
0x120b   : > { %929 = vrot.lane.b32.xlu1 %v1390_v8, %s1426_s29 }
0x127d   : > { %v930_v9 = vpop.permute.xlu1 %929 }
0x127e   : > { %v932_v10 = vmul.f32 %v1388_v61, %v930_v9 }
0x1280   : > { %935 = vrot.lane.b32.xlu0 %v932_v10, %s1427_s30 }
0x12f2   : > { %v936_v11 = vpop.permute.xlu0 %935 }
0x12f3   : > { %1171 = vst.msk [vmem:[%s1470_s20 + $0xc] sm:$0x3] %vm305_vm3, %v936_v11  ;;  %1303 = vmatmul.mubr.msk.f32.vlgmr.msra.gmra.mxu1 %vm197_vm2, %v936_v11 }
0x13b3   : > { %v1009_v13 = vpop.f32.mrf.mxu1 }
0x13b4   : > { %v1013_v14 = vadd.f32 %v1162_v12, %v1009_v13 }
0x13b5   : > { %v1304_v15 = vpop.f32.mrf.mxu1 }
0x13b6   : > { %1391 = vtanh.f32 %v1013_v14  ;;  %v1173_v17 = vmul.f32 -1.442695, %v1013_v14 }
0x13b8   : > { %1393 = vpow2.f32 %v1173_v17 }
0x13c3   : > { %v1392_v16 = vpop.eup %1391 }
0x13c4   : > { %1023 = vrot.lane.b32.xlu1 %v1392_v16, %s1426_s29 }
0x13c5   : > { %v1394_v18 = vpop.eup %1393 }
0x13c6   : > { %v1017_v19 = vadd.f32 1.0, %v1394_v18 }
0x13c8   : > { %1395 = vrcp.f32 %v1017_v19 }
0x13d5   : > { %v1396_v20 = vpop.eup %1395 }
0x13d6   : > { %v1021_v23 = vmul.f32 %v1396_v20, %v926_v7 }
0x1436   : > { %v1024_v21 = vpop.permute.xlu1 %1023 }
0x1437   : > { %v1026_v22 = vmul.f32 %v1396_v20, %v1024_v21 }
0x1439   : > { %1028 = vrot.lane.b32.xlu0 %v1026_v22, %s1426_s29 }
0x14ab   : > { %v1029_v24 = vpop.permute.xlu0 %1028 }
0x14ac   : > { %v1031_v25 = vadd.f32 %v1029_v24, %v1021_v23 }
0x14ae   : > { %1397 = vtanh.f32 %v1031_v25 }
0x14bb   : > { %v1398_v26 = vpop.eup %1397 }
0x14bc   : > { %1034 = vrot.lane.b32.xlu1 %v1398_v26, %s1426_s29 }
0x14c0   : > { %1048 = vrot.lane.b32.xlu1 %v1031_v25, %s1428_s3 }
0x152e   : > { %v1035_v27 = vpop.permute.xlu1 %1034 }
0x152f   : > { %v1037_v28 = vmul.f32 %v1396_v20, %v1035_v27 }
0x1531   : > { %1040 = vrot.lane.b32.xlu0 %v1037_v28, %s1427_s30 }
0x1532   : > { %v1049_v29 = vpop.permute.xlu1 %1048 }
0x1533   : > { %1051 = vst.msk [vmem:[#allocation3] sm:$0x3] %vm305_vm3, %v1049_v29 }
0x15a3   : > { %v1041_v30 = vpop.permute.xlu0 %1040 }
0x15a4   : > { %1174 = vst.msk [vmem:[%s1470_s20 + $0xe] sm:$0x3] %vm305_vm3, %v1041_v30  ;;  %1046 = vst.msk [vmem:[#allocation2] sm:$0x3] %vm305_vm3, %v1041_v30 }
0x15a5 PF: > { %s12_s11 = sadd.s32 1, %s1421_s11   ;;  %s1651_s9 = smov %s1417_s10 }
0x15a6   : > { %p9_p6 = scmp.ge.s32.totalorder %s12_s11, 4   ;;  %s1652_s10 = smov %s1654_s12 }
0x15a8   :  { %11 = sbr.rel (!%p9_p6) target bundleno = 2 (0x2), region = 72 }

</bundles_post_ra>
